<compile_context>
chip_gen: v5e
topology: v5e:2x2
jax: 0.10.0
libtpu: 0.0.40
codegen_flags: <defaults>
</compile_context>

<pallas_src>
import jax
import jax.numpy as jnp
from jax import lax
from jax.experimental import pallas as pl
from jax.experimental.pallas import tpu as pltpu

M = 30
INPUT_DIM = 10
OUTPUT_DIM = 5

# Batch-tile cap.  Per-row VMEM cost (f32, padded (8,128) layout):
#   x block (tm, 10): 512 B/row,  out block (5, tm): 32 B/row
# Double-buffered total ~= 1.1 KB/row -> TM=8192 ~= 9 MiB, fits v5e's 16 MiB
# default scoped VMEM and leaves large headroom on v6e/v7x.
TM_CAP = 8192
# Below this, a single grid step is cheaper than splitting for megacore.
SINGLE_STEP_B = 256


def _round_up(n, m):
    return ((n + m - 1) // m) * m


def _pick_tm(B):
    if B <= SINGLE_STEP_B:
        return B
    # >= 2 grid steps so both v7x TensorCores get work; tm multiple of 128.
    return min(TM_CAP, _round_up(pl.cdiv(B, 2), 128))


def custom_net_kernel(x_ref, w_ref, b_ref, o_ref):
    # x_ref: (TM, INPUT_DIM)          batch on sublanes, features on lanes
    # w_ref: (OUTPUT_DIM, INPUT_DIM)  native nn.Linear layout
    # b_ref: (OUTPUT_DIM, 1)
    # o_ref: (OUTPUT_DIM, TM)         transposed: batch lane-dense -> unmasked vst
    x = x_ref[...]
    w = w_ref[...]
    b = b_ref[...]

    # fc^T = W @ x^T (contract over INPUT_DIM).  Compute is tiny (K=10, M=5);
    # the MXU handles the layout, no explicit in-kernel transpose of x.
    fc_t = lax.dot_general(
        w, x, (((1,), (1,)), ((), ())),
        preferred_element_type=jnp.float32) + b            # (OUTPUT_DIM, TM)

    relu_t = jnp.maximum(fc_t, 0.0)

    # CustomSoftmax over the feature axis (PyTorch dim=1 -> axis 0 here).
    # Shift by the per-column max: mathematically identical (softmax is
    # shift-invariant), but avoids exp(30*x) overflowing f32.
    scaled = jnp.float32(M) * relu_t
    shifted = scaled - jnp.max(scaled, axis=0, keepdims=True)
    exp_t = jnp.exp(shifted)
    denom = jnp.sum(exp_t, axis=0, keepdims=True)          # (1, TM)
    softmax_t = exp_t * pl.reciprocal(denom, approx=False)  # exact (1e-5 tol)

    o_ref[...] = (relu_t * softmax_t).astype(o_ref.dtype)


def prepare_params(weight, bias):
    """One-time parameter prep at init (NOT per forward call)."""
    return weight, bias.reshape(OUTPUT_DIM, 1)


def custom_net_forward(x, weight, bias2d, *, tm=None, return_transposed=False):
    """x: (B, INPUT_DIM) f32; weight: (OUTPUT_DIM, INPUT_DIM); bias2d: (OUTPUT_DIM, 1).

    Returns (B, OUTPUT_DIM) by default.  Pass return_transposed=True to get the
    kernel-native (OUTPUT_DIM, B) layout and skip the extra XLA transpose pass.
    """
    B = x.shape[0]
    if tm is None:
        tm = _pick_tm(B)
    grid = (pl.cdiv(B, tm),)

    out_t = pl.pallas_call(
        custom_net_kernel,
        out_shape=jax.ShapeDtypeStruct((OUTPUT_DIM, B), jnp.float32),
        grid=grid,
        in_specs=[
            # TODO(synk): if the producer can emit x as (INPUT_DIM, B), tile it
            # (10, tm) to cut x VMEM 8x and keep batch lane-dense end to end.
            pl.BlockSpec((tm, INPUT_DIM), lambda i: (i, 0)),
            pl.BlockSpec((OUTPUT_DIM, INPUT_DIM), lambda i: (0, 0)),
            pl.BlockSpec((OUTPUT_DIM, 1), lambda i: (0, 0)),
        ],
        out_specs=pl.BlockSpec((OUTPUT_DIM, tm), lambda i: (0, i)),
        compiler_params=pltpu.CompilerParams(
            dimension_semantics=("parallel",),
            vmem_limit_bytes=32 << 20),
    )(x, weight, bias2d)

    if return_transposed:
        return out_t
    # Layout plumbing back to the module's (B, OUTPUT_DIM) contract.
    return out_t.T


def reference_forward(x, weight, bias):
    fc = x @ weight.T + bias
    relu_out = jnp.maximum(fc, 0.0)
    exp_x = jnp.exp(M * relu_out)
    softmax_out = exp_x / jnp.sum(exp_x, axis=1, keepdims=True)
    return relu_out * softmax_out


if __name__ == "__main__":
    key = jax.random.PRNGKey(0)
    k_x, k_w, k_b, k_x2 = jax.random.split(key, 4)

    # Deterministic nn.Linear-style init: U(-1/sqrt(in), 1/sqrt(in))
    bound = 1.0 / (INPUT_DIM ** 0.5)
    weight = jax.random.uniform(
        k_w, (OUTPUT_DIM, INPUT_DIM), jnp.float32, -bound, bound)
    bias = jax.random.uniform(
        k_b, (OUTPUT_DIM,), jnp.float32, -bound, bound)
    w_p, b_p = prepare_params(weight, bias)

    # Small single-block case (batch = 8), matching the module's natural size.
    B = 8
    x = jax.random.normal(k_x, (B, INPUT_DIM), jnp.float32)
    out = jax.block_until_ready(custom_net_forward(x, w_p, b_p))
    ref = reference_forward(x, weight, bias)
    assert out.shape == (B, OUTPUT_DIM)
    assert jnp.allclose(out, ref, rtol=1e-5, atol=1e-5), "mismatch vs reference (B=8)"

    # Multi-block path: exercises the batch grid (>=2 steps for megacore),
    # the lane-dense tiled output, and the kernel-native transposed return.
    B2 = 512
    x2 = jax.random.normal(k_x2, (B2, INPUT_DIM), jnp.float32)
    out2_t = jax.block_until_ready(
        custom_net_forward(x2, w_p, b_p, return_transposed=True))
    ref2 = reference_forward(x2, weight, bias)
    assert out2_t.shape == (OUTPUT_DIM, B2)
    assert jnp.allclose(out2_t.T, ref2, rtol=1e-5, atol=1e-5), \
        "mismatch vs reference (B=512)"

    print("KERNEL_OK")
</pallas_src>

<mosaic_0001>
module attributes {stable_mosaic.version = 11 : i64} {
  func.func @custom_net_kernel(%arg0: i32, %arg1: memref<8x10xf32, #tpu.memory_space<vmem>>, %arg2: memref<5x10xf32, #tpu.memory_space<vmem>>, %arg3: memref<5x1xf32, #tpu.memory_space<vmem>>, %arg4: memref<5x8xf32, #tpu.memory_space<vmem>>) attributes {dimension_semantics = [#tpu.dimension_semantics<parallel>], iteration_bounds = array<i64: 1>, scalar_prefetch = 0 : i64, scratch_operands = 0 : i64, tpu.core_type = #tpu.core_type<tc>, window_params = [{transform_indices = @transform_0, window_bounds = array<i64: 8, 10>}, {pipeline_mode = #tpu.pipeline_mode<synchronous>, transform_indices = @transform_1, window_bounds = array<i64: 5, 10>}, {pipeline_mode = #tpu.pipeline_mode<synchronous>, transform_indices = @transform_2, window_bounds = array<i64: 5, 1>}, {transform_indices = @transform_3, window_bounds = array<i64: 5, 8>}]} {
    %c0 = arith.constant 0 : index
    %c0_0 = arith.constant 0 : index
    %0 = vector.load %arg1[%c0, %c0_0] : memref<8x10xf32, #tpu.memory_space<vmem>>, vector<8x10xf32>
    %c0_1 = arith.constant 0 : index
    %c0_2 = arith.constant 0 : index
    %1 = vector.load %arg2[%c0_1, %c0_2] : memref<5x10xf32, #tpu.memory_space<vmem>>, vector<5x10xf32>
    %c0_3 = arith.constant 0 : index
    %c0_4 = arith.constant 0 : index
    %2 = vector.load %arg3[%c0_3, %c0_4] : memref<5x1xf32, #tpu.memory_space<vmem>>, vector<5x1xf32>
    %cst = arith.constant dense<0.000000e+00> : vector<5x8xf32>
    %3 = tpu.matmul %1, %0, %cst {dimension_numbers = #tpu.dot_dimension_numbers<[1], [1], [0], [0], [0, 0, 1, 0], [], []>} : vector<5x10xf32>, vector<8x10xf32>, vector<5x8xf32> -> vector<5x8xf32>
    %4 = vector.broadcast %2 : vector<5x1xf32> to vector<5x8xf32>
    %5 = arith.addf %3, %4 : vector<5x8xf32>
    %cst_5 = arith.constant 0.000000e+00 : f32
    %6 = vector.broadcast %cst_5 : f32 to vector<5x8xf32>
    %7 = arith.maximumf %5, %6 : vector<5x8xf32>
    %cst_6 = arith.constant 3.000000e+01 : f32
    %8 = vector.broadcast %cst_6 : f32 to vector<5x8xf32>
    %9 = arith.mulf %8, %7 : vector<5x8xf32>
    %cst_7 = arith.constant dense<0xFF800000> : vector<8xf32>
    %10 = vector.multi_reduction <maximumf>, %9, %cst_7 [0] : vector<5x8xf32> to vector<8xf32>
    %11 = vector.shape_cast %10 : vector<8xf32> to vector<1x8xf32>
    %12 = vector.broadcast %11 : vector<1x8xf32> to vector<5x8xf32>
    %13 = arith.subf %9, %12 : vector<5x8xf32>
    %14 = math.exp %13 : vector<5x8xf32>
    %cst_8 = arith.constant dense<0.000000e+00> : vector<8xf32>
    %15 = vector.multi_reduction <add>, %14, %cst_8 [0] : vector<5x8xf32> to vector<8xf32>
    %16 = vector.shape_cast %15 : vector<8xf32> to vector<1x8xf32>
    %17 = tpu.reciprocal %16 : vector<1x8xf32> -> vector<1x8xf32>
    %18 = vector.broadcast %17 : vector<1x8xf32> to vector<5x8xf32>
    %19 = arith.mulf %14, %18 : vector<5x8xf32>
    %20 = arith.mulf %7, %19 : vector<5x8xf32>
    %c0_9 = arith.constant 0 : index
    %c0_10 = arith.constant 0 : index
    %21 = vector.load %arg4[%c0_9, %c0_10] : memref<5x8xf32, #tpu.memory_space<vmem>>, vector<5x8xf32>
    tpu.vector_store %arg4[%c0_9, %c0_10], %20 {strides = array<i32>} : memref<5x8xf32, #tpu.memory_space<vmem>>, vector<5x8xf32>,
    return
  }
  func.func @transform_0(%arg0: i32) -> (i32, i32) {
    %c0_i32 = arith.constant 0 : i32
    %c0_i32_0 = arith.constant 0 : i32
    return %arg0, %c0_i32 : i32, i32
  }
  func.func @transform_1(%arg0: i32) -> (i32, i32) {
    %c0_i32 = arith.constant 0 : i32
    %c0_i32_0 = arith.constant 0 : i32
    %c0_i32_1 = arith.constant 0 : i32
    return %c0_i32, %c0_i32_0 : i32, i32
  }
  func.func @transform_2(%arg0: i32) -> (i32, i32) {
    %c0_i32 = arith.constant 0 : i32
    %c0_i32_0 = arith.constant 0 : i32
    %c0_i32_1 = arith.constant 0 : i32
    return %c0_i32, %c0_i32_0 : i32, i32
  }
  func.func @transform_3(%arg0: i32) -> (i32, i32) {
    %c0_i32 = arith.constant 0 : i32
    %c0_i32_0 = arith.constant 0 : i32
    return %c0_i32, %arg0 : i32, i32
  }
}

</mosaic_0001>

<bundles_post_ra>
// kernel: tpu_custom_call.1
= control target key start
LH: loop header
LB: loop body
LE: loop exit
PB: predicated region body
PF: predicated region fallthrough
CT: control target
= control target key end

     0   :  { %8 = vsyncpa [#allocation3], 0  ;;  %s218_s0 = inlined_call_operand.vmem [shape: f32[8,10], index: 0, kind: input, shape index: {}]   ;;  %s219_s1 = inlined_call_operand.hbm [shape: f32[5,10], index: 1, kind: input, shape index: {}]   ;;  %s220_s2 = inlined_call_operand.vmem [shape: f32[5,1], index: 2, kind: input, shape index: {}]   ;;  %s221_s3 = inlined_call_operand.hbm [shape: f32[5,8], index: 3, kind: output, shape index: {}]  }
   0x1   :  { %9 = vsyncpa [#allocation4], 0  ;;  %s17_s14 = sshll.u32 %s219_s1, 4  ;;  %s180_s15 = smov [#allocation2]   ;;  %s18_s14 = int_to_ptr.hbm [resolvable:$true] %s17_s14 }
   0x2   :  { %s19_s16 = sshll.u32 %s180_s15, 4  ;;  %s20_s16 = int_to_ptr.vmem [resolvable:$true] %s19_s16 }
   0x3   :  { %22 = dma.hbm_to_vmem [thread:$0]  %s18_s14, 128, %s20_s16, [#allocation3]  }
   0x4   :  { %176 = dma.done.wait [#allocation3], 128  }
   0x5   :  { %177 = vsyncadd [#allocation3], 4294967168  ;;  %v181_v0 = vmov 0   ;;  %vm37_vm0 = vcmask 80896   ;;  %v29_v1 = vld [vmem:[%s218_s0] sm:$0xff]  ;;  %vm66_vm1 = vcmask 61440  }
   0x6   :  { %123 = vset.pattern.permute.xlu0 %v181_v0  ;;  %v31_v2 = vld [vmem:[%s220_s2] sm:$0x1f]  ;;  %118 = vmatpush.xpose.msk.msra.mxu0 %vm37_vm0, %v29_v1  ;;  %s182_s0 = smov [#allocation5]   ;;  %s108_s22 = sshll.u32 %s221_s3, 4  ;;  %s109_s22 = int_to_ptr.hbm [resolvable:$true] %s108_s22 }
   0x7   :  { %v30_v3 = vld [vmem:[#allocation2] sm:$0x1f]  ;;  %34 = vperm.xlu0 %123, %v31_v2   ;;  %s106_s1 = sshll.u32 %s182_s0, 4  ;;  %s107_s1 = int_to_ptr.vmem [resolvable:$true] %s106_s1 }
   0x9   :  { %119 = vmatmul.msk.f32.vlgmr.msra.gmra.mxu0 %vm37_vm0, %v30_v3 }
  0x79   :  { %v35_v4 = vpop.permute.xlu0 %34 }
  0x86   :  { %v61_v5 = vpop.f32.mrf.mxu0 }
  0x87   :  { %v62_v6 = vadd.f32 %v61_v5, %v35_v4 }
  0x89   :  { %v64_v7 = vmax.f32 %v62_v6, 0.0 }
  0x8b   :  { %v65_v8 = vmul.f32 30.0, %v64_v7 }
  0x8d   :  { %v67_v9 = vsel %vm66_vm1, %v65_v8, -inf }
  0x8e   :  { %v68_v10 = vrot.slane %v67_v9, 4 }
  0x90   :  { %v69_v11 = vmax.f32 %v67_v9, %v68_v10 }
  0x92   :  { %v70_v12 = vrot.slane %v69_v11, 2 }
  0x94   :  { %v71_v13 = vmax.f32 %v69_v11, %v70_v12 }
  0x96   :  { %v72_v14 = vrot.slane %v71_v13, 1 }
  0x98   :  { %v73_v15 = vmax.f32 %v71_v13, %v72_v14 }
  0x9a   :  { %v74_v16 = vsub.f32 %v65_v8, %v73_v15 }
  0x9c   :  { %v75_v17 = vmul.f32 1.442695, %v74_v16 }
  0x9e   :  { %124 = vpow2.f32 %v75_v17 }
  0xa4   :  { %v125_v18 = vpop.eup %124 }
  0xa5   :  { %v77_v19 = vsel %vm66_vm1, %v125_v18, 0.0 }
  0xa6   :  { %v78_v20 = vrot.slane %v77_v19, 4 }
  0xa8   :  { %v79_v21 = vadd.f32 %v78_v20, %v77_v19 }
  0xaa   :  { %v80_v22 = vrot.slane %v79_v21, 2 }
  0xac   :  { %v81_v23 = vadd.f32 %v80_v22, %v79_v21 }
  0xae   :  { %v82_v24 = vrot.slane %v81_v23, 1 }
  0xb0   :  { %v83_v25 = vadd.f32 %v82_v24, %v81_v23 }
  0xb2   :  { %126 = vrcp.f32 %v83_v25  ;;  %v95_v29 = vand.u32 2147483648, %v83_v25  ;;  %v93_v31 = vand.u32 2147483647, %v83_v25  ;;  %vm89_vm3 = vweird.f32 %v83_v25 }
  0xb4   :  { %v96_v33 = vor.u32 1.1754944e-38, %v95_v29  ;;  %vm94_vm5 = vcmp.eq.f32.partialorder %v93_v31, 8.507059e+37 }
  0xb8   :  { %v127_v26 = vpop.eup %126 }
  0xb9   :  { %v85_v27 = vmul.f32 %v127_v26, %v83_v25  ;;  %vm90_vm2 = vweird.f32 %v127_v26 }
  0xba   :  { %vm91_vm4 = vmor %vm89_vm3, %vm90_vm2 }
  0xbb   :  { %v86_v28 = vsub.f32 1.0, %v85_v27 }
  0xbd   :  { %v87_v30 = vmul.f32 %v127_v26, %v86_v28 }
  0xbf   :  { %v88_v32 = vadd.f32 %v127_v26, %v87_v30 }
  0xc1   :  { %v92_v34 = vsel %vm91_vm4, %v127_v26, %v88_v32 }
  0xc2   :  { %v97_v35 = vsel %vm94_vm5, %v96_v33, %v92_v34 }
  0xc3   :  { %v98_v36 = vmul.f32 %v125_v18, %v97_v35 }
  0xc5   :  { %v99_v37 = vmul.f32 %v98_v36, %v64_v7 }
  0xc7   :  { %100 = vst.msk [vmem:[#allocation5] sm:$0x1f] %vm66_vm1, %v99_v37 }
  0xc8   :  { %111 = dma.vmem_to_hbm [thread:$0]  %s107_s1, 128, %s109_s22, [#allocation4]  }
  0xc9   :  { %178 = dma.done.wait [#allocation4], 128  }
  0xca   :  { %179 = vsyncadd [#allocation4], 4294967168 }
  0xcb   :  { %116 = vsyncpa [#allocation3], 1 }
  0xcc   :  { %117 = vsyncpa [#allocation4], 1 }

</bundles_post_ra>
